<compile_context>
chip_gen: v6e
topology: v6e:2x2x1
jax: 0.10.0
libtpu: 0.0.40
codegen_flags: <defaults>
</compile_context>

<pallas_src>
import jax
import jax.numpy as jnp
from jax.experimental import pallas as pl
from jax.experimental.pallas import tpu as pltpu

EPS = 1e-5  # PyTorch BatchNorm2d default eps


# --------------------------- kernel 1: conv + stats ---------------------------
def conv_stats_kernel(x_ref, w_ref, y_ref, stat_ref):
    """Conv3x3 as banded matmuls + per-tile BN sufficient statistics.

    x_ref    : (B, H+2, (W+2)*Cin)    bf16  zero-padded, lane-dense input tile
    w_ref    : (3, (W+2)*Cin, W*Cout) bf16  banded (block-Toeplitz) weights
    y_ref    : (B, H, W*Cout)         f32   raw conv output (lane-dense)
    stat_ref : (1, 2, W*Cout)         f32   [sum ; sum-of-squares] of this tile
    """
    B, Hp2, _ = x_ref.shape
    H = Hp2 - 2
    WCout = y_ref.shape[-1]

    x = x_ref[...]
    acc = None
    for dh in range(3):  # static unroll over the 3 row taps
        xs = x[:, dh:dh + H, :].reshape(B * H, -1)            # (B*H, (W+2)*Cin)
        part = jnp.dot(xs, w_ref[dh], preferred_element_type=jnp.float32)
        acc = part if acc is None else acc + part             # (B*H, W*Cout) f32

    y_ref[...] = acc.reshape(B, H, WCout)

    # Per-(w, cout) partial sums: sublane reductions (XLU), essentially free.
    s1 = jnp.sum(acc, axis=0, keepdims=True)                  # (1, W*Cout)
    s2 = jnp.sum(acc * acc, axis=0, keepdims=True)
    stat_ref[0] = jnp.concatenate([s1, s2], axis=0)           # (2, W*Cout)


# --------------------------- kernel 2: BN + ReLU6 -----------------------------
def bn_relu6_kernel(y_ref, scale_ref, shift_ref, o_ref):
    """Folded BN (single FMA, lane-tiled per-channel scale/shift) + ReLU6."""
    y = y_ref[...] * scale_ref[...] + shift_ref[...]
    o_ref[...] = jnp.minimum(jnp.maximum(y, 0.0), 6.0)


# --------------------------------- wrapper ------------------------------------
def _pick_batch_tile(n, per_image_bytes, budget_bytes=4 << 20):
    """Largest divisor of n whose tile fits a conservative VMEM budget."""
    bt = int(max(1, min(n, budget_bytes // max(per_image_bytes, 1))))
    while n % bt:
        bt -= 1
    return bt


def _banded_conv_weights(w_hwio, W):
    """(3,3,Cin,Cout) HWIO -> (3, (W+2)*Cin, W*Cout) banded weights so a 3x3
    conv over a zero-padded lane-dense (H+2, (W+2)*Cin) image is 3 matmuls."""
    _, _, Cin, Cout = w_hwio.shape
    blk = w_hwio.reshape(3, 3 * Cin, Cout)                    # (dh, dw*Cin+ci, co)
    wb = jnp.zeros((3, (W + 2) * Cin, W * Cout), jnp.float32)
    for wo in range(W):                                       # disjoint column blocks
        wb = wb.at[:, wo * Cin:(wo + 3) * Cin, wo * Cout:(wo + 1) * Cout].set(blk)
    return wb


def conv_block(x_nchw, params):
    """x_nchw: (N, Cin, H, W) f32 -> (N, Cout, H, W) f32.  Conv3x3 + BN(train) + ReLU6."""
    N, Cin, H, W = x_nchw.shape
    Cout = params["w"].shape[-1]
    WCin = (W + 2) * Cin
    WCout = W * Cout

    # Host-side layout: NCHW -> NHWC, zero pad, fold W & C into the lane axis, bf16.
    x = jnp.transpose(x_nchw, (0, 2, 3, 1)).astype(jnp.float32)
    xp = jnp.pad(x, ((0, 0), (1, 1), (1, 1), (0, 0)))
    xp = xp.reshape(N, H + 2, WCin).astype(jnp.bfloat16)
    wb = _banded_conv_weights(params["w"].astype(jnp.float32), W).astype(jnp.bfloat16)
    # NOTE: conv bias is intentionally NOT passed -- it cancels under training BN.

    per_image_bytes = (H + 2) * WCin * 2 + H * WCout * 4
    bt = _pick_batch_tile(N, per_image_bytes)
    nt = N // bt

    cost1 = pl.CostEstimate(
        flops=2 * N * H * (3 * WCin) * WCout + 3 * N * H * WCout,
        transcendentals=0,
        bytes_accessed=2 * xp.size + 2 * wb.size + 4 * N * H * WCout + 4 * nt * 2 * WCout)

    y, stats = pl.pallas_call(
        conv_stats_kernel,
        out_shape=(jax.ShapeDtypeStruct((N, H, WCout), jnp.float32),
                   jax.ShapeDtypeStruct((nt, 2, WCout), jnp.float32)),
        grid_spec=pltpu.PrefetchScalarGridSpec(
            num_scalar_prefetch=0,
            grid=(nt,),
            in_specs=[
                pl.BlockSpec((bt, H + 2, WCin), lambda n: (n, 0, 0)),
                pl.BlockSpec((3, WCin, WCout), lambda n: (0, 0, 0)),
            ],
            out_specs=(
                pl.BlockSpec((bt, H, WCout), lambda n: (n, 0, 0)),
                pl.BlockSpec((1, 2, WCout), lambda n: (n, 0, 0)),
            )),
        compiler_params=pltpu.CompilerParams(
            dimension_semantics=("parallel",),
            vmem_limit_bytes=32 * 1024 * 1024),
        cost_estimate=cost1,
    )(xp, wb)

    # Tiny (Cout,)-sized global BN math between the two kernels (plain JAX).
    cnt = jnp.float32(N * H * W)
    ssum = stats[:, 0, :].reshape(nt * W, Cout).sum(axis=0)
    ssq = stats[:, 1, :].reshape(nt * W, Cout).sum(axis=0)
    mean = ssum / cnt
    var = jnp.maximum(ssq / cnt - mean * mean, 0.0)           # clamp cancellation
    scale = params["gamma"].astype(jnp.float32) * jax.lax.rsqrt(var + EPS)
    shift = params["beta"].astype(jnp.float32) - mean * scale
    scale_t = jnp.tile(scale, W).reshape(1, WCout)            # lane = w*Cout + co
    shift_t = jnp.tile(shift, W).reshape(1, WCout)

    cost2 = pl.CostEstimate(
        flops=4 * N * H * WCout, transcendentals=0,
        bytes_accessed=8 * N * H * WCout + 8 * WCout)

    out_flat = pl.pallas_call(
        bn_relu6_kernel,
        out_shape=jax.ShapeDtypeStruct((N, H, WCout), jnp.float32),
        grid_spec=pltpu.PrefetchScalarGridSpec(
            num_scalar_prefetch=0,
            grid=(nt,),
            in_specs=[
                pl.BlockSpec((bt, H, WCout), lambda n: (n, 0, 0)),
                pl.BlockSpec((1, WCout), lambda n: (0, 0)),
                pl.BlockSpec((1, WCout), lambda n: (0, 0)),
            ],
            out_specs=pl.BlockSpec((bt, H, WCout), lambda n: (n, 0, 0))),
        compiler_params=pltpu.CompilerParams(
            dimension_semantics=("parallel",),
            vmem_limit_bytes=32 * 1024 * 1024),
        cost_estimate=cost2,
    )(y, scale_t, shift_t)

    return jnp.transpose(out_flat.reshape(N, H, W, Cout), (0, 3, 1, 2))


# ----------------------------- pure-JAX reference -----------------------------
def reference(x_nchw, params):
    x = jnp.transpose(x_nchw, (0, 2, 3, 1)).astype(jnp.float32)
    Cout = params["w"].shape[-1]
    y = jax.lax.conv_general_dilated(
        x, params["w"].astype(jnp.float32), window_strides=(1, 1),
        padding=[(1, 1), (1, 1)], dimension_numbers=("NHWC", "HWIO", "NHWC"))
    y = y + params["b"].reshape(1, 1, 1, Cout)   # conv bias (cancels under BN)
    mu = jnp.mean(y, axis=(0, 1, 2), keepdims=True)
    var = jnp.mean((y - mu) ** 2, axis=(0, 1, 2), keepdims=True)
    y = (y - mu) / jnp.sqrt(var + EPS) * params["gamma"].reshape(1, 1, 1, Cout) \
        + params["beta"].reshape(1, 1, 1, Cout)
    y = jnp.clip(y, 0.0, 6.0)
    return jnp.transpose(y, (0, 3, 1, 2))


# ------------------------------------ main -------------------------------------
if __name__ == "__main__":
    N, Cin, Cout, H, W = 2, 4, 8, 16, 16

    key = jax.random.PRNGKey(0)
    ks = jax.random.split(key, 6)
    params = {
        "w": 0.1 * jax.random.normal(ks[0], (3, 3, Cin, Cout), jnp.float32),
        "b": 0.1 * jax.random.normal(ks[1], (Cout,), jnp.float32),
        "gamma": 1.0 + 0.1 * jax.random.normal(ks[2], (Cout,), jnp.float32),
        "beta": 0.1 * jax.random.normal(ks[3], (Cout,), jnp.float32),
    }
    x = jax.random.normal(ks[4], (N, Cin, H, W), jnp.float32)

    out = jax.jit(conv_block)(x, params)
    out = jax.block_until_ready(out)
    assert out.shape == (N, Cout, H, W), out.shape

    # (a) exact-semantics f32 reference; loose tol because the kernel's conv
    #     operands are bf16 (f32 accumulation on the MXU).
    ref_f32 = reference(x, params)
    err_f32 = float(jnp.max(jnp.abs(out - ref_f32)))
    assert err_f32 < 5e-2, f"max abs error vs f32 reference: {err_f32}"

    # (b) same math with conv operands pre-rounded to bf16 (what the MXU sees);
    #     the kernel must match this tightly.
    xq = x.astype(jnp.bfloat16).astype(jnp.float32)
    params_q = dict(params, w=params["w"].astype(jnp.bfloat16).astype(jnp.float32))
    ref_bf16 = reference(xq, params_q)
    err_bf16 = float(jnp.max(jnp.abs(out - ref_bf16)))
    assert err_bf16 < 2e-3, f"max abs error vs bf16-operand reference: {err_bf16}"

    print("KERNEL_OK")
</pallas_src>

<mosaic_0001>
module attributes {stable_mosaic.version = 11 : i64} {
  func.func @conv_stats_kernel(%arg0: i32, %arg1: memref<2x18x72xbf16, #tpu.memory_space<vmem>>, %arg2: memref<3x72x128xbf16, #tpu.memory_space<vmem>>, %arg3: memref<2x16x128xf32, #tpu.memory_space<vmem>>, %arg4: memref<1x2x128xf32, #tpu.memory_space<vmem>>) attributes {dimension_semantics = [#tpu.dimension_semantics<parallel>], iteration_bounds = array<i64: 1>, scalar_prefetch = 0 : i64, scratch_operands = 0 : i64, tpu.core_type = #tpu.core_type<tc>, window_params = [{transform_indices = @transform_0, window_bounds = array<i64: 2, 18, 72>}, {pipeline_mode = #tpu.pipeline_mode<synchronous>, transform_indices = @transform_1, window_bounds = array<i64: 3, 72, 128>}, {transform_indices = @transform_2, window_bounds = array<i64: 2, 16, 128>}, {transform_indices = @transform_3, window_bounds = array<i64: 1, 2, 128>}]} {
    %c0 = arith.constant 0 : index
    %c0_0 = arith.constant 0 : index
    %c0_1 = arith.constant 0 : index
    %0 = vector.load %arg1[%c0, %c0_0, %c0_1] : memref<2x18x72xbf16, #tpu.memory_space<vmem>>, vector<2x18x72xbf16>
    %1 = vector.extract_strided_slice %0 {offsets = [0, 0, 0], sizes = [2, 16, 72], strides = [1, 1, 1]} : vector<2x18x72xbf16> to vector<2x16x72xbf16>
    %2 = vector.shape_cast %1 : vector<2x16x72xbf16> to vector<32x72xbf16>
    %c0_2 = arith.constant 0 : index
    %c0_3 = arith.constant 0 : index
    %c0_4 = arith.constant 0 : index
    %3 = vector.load %arg2[%c0_2, %c0_3, %c0_4] : memref<3x72x128xbf16, #tpu.memory_space<vmem>>, vector<1x72x128xbf16>
    %4 = vector.shape_cast %3 : vector<1x72x128xbf16> to vector<72x128xbf16>
    %cst = arith.constant dense<0.000000e+00> : vector<32x128xf32>
    %5 = tpu.matmul %2, %4, %cst {dimension_numbers = #tpu.dot_dimension_numbers<[1], [0], [0], [1], [0, 0, 1, 1], [], []>} : vector<32x72xbf16>, vector<72x128xbf16>, vector<32x128xf32> -> vector<32x128xf32>
    %6 = vector.extract_strided_slice %0 {offsets = [0, 1, 0], sizes = [2, 16, 72], strides = [1, 1, 1]} : vector<2x18x72xbf16> to vector<2x16x72xbf16>
    %7 = vector.shape_cast %6 : vector<2x16x72xbf16> to vector<32x72xbf16>
    %c1 = arith.constant 1 : index
    %c0_5 = arith.constant 0 : index
    %c0_6 = arith.constant 0 : index
    %8 = vector.load %arg2[%c1, %c0_5, %c0_6] : memref<3x72x128xbf16, #tpu.memory_space<vmem>>, vector<1x72x128xbf16>
    %9 = vector.shape_cast %8 : vector<1x72x128xbf16> to vector<72x128xbf16>
    %cst_7 = arith.constant dense<0.000000e+00> : vector<32x128xf32>
    %10 = tpu.matmul %7, %9, %cst_7 {dimension_numbers = #tpu.dot_dimension_numbers<[1], [0], [0], [1], [0, 0, 1, 1], [], []>} : vector<32x72xbf16>, vector<72x128xbf16>, vector<32x128xf32> -> vector<32x128xf32>
    %11 = arith.addf %5, %10 : vector<32x128xf32>
    %12 = vector.extract_strided_slice %0 {offsets = [0, 2, 0], sizes = [2, 16, 72], strides = [1, 1, 1]} : vector<2x18x72xbf16> to vector<2x16x72xbf16>
    %13 = vector.shape_cast %12 : vector<2x16x72xbf16> to vector<32x72xbf16>
    %c2 = arith.constant 2 : index
    %c0_8 = arith.constant 0 : index
    %c0_9 = arith.constant 0 : index
    %14 = vector.load %arg2[%c2, %c0_8, %c0_9] : memref<3x72x128xbf16, #tpu.memory_space<vmem>>, vector<1x72x128xbf16>
    %15 = vector.shape_cast %14 : vector<1x72x128xbf16> to vector<72x128xbf16>
    %cst_10 = arith.constant dense<0.000000e+00> : vector<32x128xf32>
    %16 = tpu.matmul %13, %15, %cst_10 {dimension_numbers = #tpu.dot_dimension_numbers<[1], [0], [0], [1], [0, 0, 1, 1], [], []>} : vector<32x72xbf16>, vector<72x128xbf16>, vector<32x128xf32> -> vector<32x128xf32>
    %17 = arith.addf %11, %16 : vector<32x128xf32>
    %18 = vector.shape_cast %17 : vector<32x128xf32> to vector<2x16x128xf32>
    %c0_11 = arith.constant 0 : index
    %c0_12 = arith.constant 0 : index
    %c0_13 = arith.constant 0 : index
    %19 = vector.load %arg3[%c0_11, %c0_12, %c0_13] : memref<2x16x128xf32, #tpu.memory_space<vmem>>, vector<2x16x128xf32>
    tpu.vector_store %arg3[%c0_11, %c0_12, %c0_13], %18 {strides = array<i32>} : memref<2x16x128xf32, #tpu.memory_space<vmem>>, vector<2x16x128xf32>,
    %cst_14 = arith.constant dense<0.000000e+00> : vector<128xf32>
    %20 = vector.multi_reduction <add>, %17, %cst_14 [0] : vector<32x128xf32> to vector<128xf32>
    %21 = vector.shape_cast %20 : vector<128xf32> to vector<1x128xf32>
    %22 = arith.mulf %17, %17 : vector<32x128xf32>
    %cst_15 = arith.constant dense<0.000000e+00> : vector<128xf32>
    %23 = vector.multi_reduction <add>, %22, %cst_15 [0] : vector<32x128xf32> to vector<128xf32>
    %24 = vector.shape_cast %23 : vector<128xf32> to vector<1x128xf32>
    %25 = tpu.concatenate %21, %24 in 0 : vector<1x128xf32>, vector<1x128xf32> -> vector<2x128xf32>
    %c0_16 = arith.constant 0 : index
    %c0_17 = arith.constant 0 : index
    %c0_18 = arith.constant 0 : index
    %26 = vector.load %arg4[%c0_16, %c0_17, %c0_18] : memref<1x2x128xf32, #tpu.memory_space<vmem>>, vector<1x2x128xf32>
    %27 = vector.shape_cast %26 : vector<1x2x128xf32> to vector<2x128xf32>
    %28 = vector.shape_cast %25 : vector<2x128xf32> to vector<1x2x128xf32>
    tpu.vector_store %arg4[%c0_16, %c0_17, %c0_18], %28 {strides = array<i32>} : memref<1x2x128xf32, #tpu.memory_space<vmem>>, vector<1x2x128xf32>,
    return
  }
  func.func @transform_0(%arg0: i32) -> (i32, i32, i32) {
    %c0_i32 = arith.constant 0 : i32
    %c0_i32_0 = arith.constant 0 : i32
    %c0_i32_1 = arith.constant 0 : i32
    return %arg0, %c0_i32, %c0_i32_0 : i32, i32, i32
  }
  func.func @transform_1(%arg0: i32) -> (i32, i32, i32) {
    %c0_i32 = arith.constant 0 : i32
    %c0_i32_0 = arith.constant 0 : i32
    %c0_i32_1 = arith.constant 0 : i32
    %c0_i32_2 = arith.constant 0 : i32
    return %c0_i32, %c0_i32_0, %c0_i32_1 : i32, i32, i32
  }
  func.func @transform_2(%arg0: i32) -> (i32, i32, i32) {
    %c0_i32 = arith.constant 0 : i32
    %c0_i32_0 = arith.constant 0 : i32
    %c0_i32_1 = arith.constant 0 : i32
    return %arg0, %c0_i32, %c0_i32_0 : i32, i32, i32
  }
  func.func @transform_3(%arg0: i32) -> (i32, i32, i32) {
    %c0_i32 = arith.constant 0 : i32
    %c0_i32_0 = arith.constant 0 : i32
    %c0_i32_1 = arith.constant 0 : i32
    return %arg0, %c0_i32, %c0_i32_0 : i32, i32, i32
  }
}

module attributes {stable_mosaic.version = 11 : i64} {
  func.func @bn_relu6_kernel(%arg0: i32, %arg1: memref<2x16x128xf32, #tpu.memory_space<vmem>>, %arg2: memref<1x128xf32, #tpu.memory_space<vmem>>, %arg3: memref<1x128xf32, #tpu.memory_space<vmem>>, %arg4: memref<2x16x128xf32, #tpu.memory_space<vmem>>) attributes {dimension_semantics = [#tpu.dimension_semantics<parallel>], iteration_bounds = array<i64: 1>, scalar_prefetch = 0 : i64, scratch_operands = 0 : i64, tpu.core_type = #tpu.core_type<tc>, window_params = [{transform_indices = @transform_0, window_bounds = array<i64: 2, 16, 128>}, {pipeline_mode = #tpu.pipeline_mode<synchronous>, transform_indices = @transform_1, window_bounds = array<i64: 1, 128>}, {pipeline_mode = #tpu.pipeline_mode<synchronous>, transform_indices = @transform_2, window_bounds = array<i64: 1, 128>}, {transform_indices = @transform_3, window_bounds = array<i64: 2, 16, 128>}]} {
    %c0 = arith.constant 0 : index
    %c0_0 = arith.constant 0 : index
    %c0_1 = arith.constant 0 : index
    %0 = vector.load %arg1[%c0, %c0_0, %c0_1] : memref<2x16x128xf32, #tpu.memory_space<vmem>>, vector<2x16x128xf32>
    %c0_2 = arith.constant 0 : index
    %c0_3 = arith.constant 0 : index
    %1 = vector.load %arg2[%c0_2, %c0_3] : memref<1x128xf32, #tpu.memory_space<vmem>>, vector<1x128xf32>
    %2 = vector.shape_cast %1 : vector<1x128xf32> to vector<1x1x128xf32>
    %3 = vector.broadcast %2 : vector<1x1x128xf32> to vector<2x16x128xf32>
    %4 = arith.mulf %0, %3 : vector<2x16x128xf32>
    %c0_4 = arith.constant 0 : index
    %c0_5 = arith.constant 0 : index
    %5 = vector.load %arg3[%c0_4, %c0_5] : memref<1x128xf32, #tpu.memory_space<vmem>>, vector<1x128xf32>
    %6 = vector.shape_cast %5 : vector<1x128xf32> to vector<1x1x128xf32>
    %7 = vector.broadcast %6 : vector<1x1x128xf32> to vector<2x16x128xf32>
    %8 = arith.addf %4, %7 : vector<2x16x128xf32>
    %cst = arith.constant 0.000000e+00 : f32
    %9 = vector.broadcast %cst : f32 to vector<2x16x128xf32>
    %10 = arith.maximumf %8, %9 : vector<2x16x128xf32>
    %cst_6 = arith.constant 6.000000e+00 : f32
    %11 = vector.broadcast %cst_6 : f32 to vector<2x16x128xf32>
    %12 = arith.minimumf %10, %11 : vector<2x16x128xf32>
    %c0_7 = arith.constant 0 : index
    %c0_8 = arith.constant 0 : index
    %c0_9 = arith.constant 0 : index
    %13 = vector.load %arg4[%c0_7, %c0_8, %c0_9] : memref<2x16x128xf32, #tpu.memory_space<vmem>>, vector<2x16x128xf32>
    tpu.vector_store %arg4[%c0_7, %c0_8, %c0_9], %12 {strides = array<i32>} : memref<2x16x128xf32, #tpu.memory_space<vmem>>, vector<2x16x128xf32>,
    return
  }
  func.func @transform_0(%arg0: i32) -> (i32, i32, i32) {
    %c0_i32 = arith.constant 0 : i32
    %c0_i32_0 = arith.constant 0 : i32
    %c0_i32_1 = arith.constant 0 : i32
    return %arg0, %c0_i32, %c0_i32_0 : i32, i32, i32
  }
  func.func @transform_1(%arg0: i32) -> (i32, i32) {
    %c0_i32 = arith.constant 0 : i32
    %c0_i32_0 = arith.constant 0 : i32
    %c0_i32_1 = arith.constant 0 : i32
    return %c0_i32, %c0_i32_0 : i32, i32
  }
  func.func @transform_2(%arg0: i32) -> (i32, i32) {
    %c0_i32 = arith.constant 0 : i32
    %c0_i32_0 = arith.constant 0 : i32
    %c0_i32_1 = arith.constant 0 : i32
    return %c0_i32, %c0_i32_0 : i32, i32
  }
  func.func @transform_3(%arg0: i32) -> (i32, i32, i32) {
    %c0_i32 = arith.constant 0 : i32
    %c0_i32_0 = arith.constant 0 : i32
    %c0_i32_1 = arith.constant 0 : i32
    return %arg0, %c0_i32, %c0_i32_0 : i32, i32, i32
  }
}

</mosaic_0001>

<bundles_post_ra>
// kernel: conv_block.2
= control target key start
LH: loop header
LB: loop body
LE: loop exit
PB: predicated region body
PF: predicated region fallthrough
CT: control target
= control target key end

     0   :  { %vm130_vm0 = vcmask 1043456   ;;  %vm29_vm1 = vsmask.f32 3328  ;;  %vm30_vm2 = vsmask.f32 7440  ;;  %vm123_vm3 = vcmask 588800   ;;  %s739_s1 = inlined_call_operand.vmem [shape: bf16[3,72,128], index: 1, kind: input, shape index: {}]   ;;  %s740_s0 = inlined_call_operand.vmem [shape: bf16[2,18,72], index: 0, kind: input, shape index: {}]   ;;  %s741_s2 = inlined_call_operand.vmem [shape: f32[2,16,128], index: 2, kind: output, shape index: {0}]   ;;  %s742_s3 = inlined_call_operand.vmem [shape: f32[1,2,128], index: 3, kind: output, shape index: {1}]  }
   0x1   :  { %v552_v0 = vld [vmem:[%s739_s1 + $0x44] ss:$0 sps:$4 sm:$0xff]   ;;  %v553_v1 = vld [vmem:[%s739_s1 + $0x20] ss:$0 sps:$4 sm:$0xff]   ;;  %v555_v5 = vld [vmem:[%s739_s1 + $0x18] sm:$0xff]   ;;  %vm280_vm4 = vcmask 1042432  }
   0x2   :  { %549 = vmatprep.subr.msk.bf16.mxu0 %vm130_vm0, %v552_v0  ;;  %v132_v2 = vsel %vm130_vm0, %v552_v0, 0  ;;  %v554_v3 = vld [vmem:[%s739_s1 + $0x3c] sm:$0xff]   ;;  %550 = vmatprep.subr.msk.bf16.mxu1 %vm130_vm0, %v553_v1  ;;  %v227_v4 = vsel %vm130_vm0, %v553_v1, 0  ;;  %v556_v6 = vld [vmem:[%s739_s1 + $0x34] sm:$0xff]   ;;  %v558_v8 = vld [vmem:[%s739_s1 + $0x2c] sm:$0xff]   ;;  %vm281_vm5 = vcmask 1046532  }
   0x3   :  { %508 = vmatpush3.bf16.msra.mxu0 %v132_v2  ;;  %522 = vmatpush3.bf16.msra.mxu1 %v227_v4  ;;  %v557_v7 = vld [vmem:[%s739_s1 + $0x10] sm:$0xff]   ;;  %v559_v9 = vld [vmem:[%s739_s1 + $0x8] sm:$0xff]   ;;  %v620_v10 = vld [vmem:[%s740_s0] sm:$0xf]  ;;  %vm428_vm8 = vcmask 1040384  }
   0x4   :  { %509 = vmatprep.subr.bf16.mxu0 %v554_v3  ;;  %523 = vmatprep.subr.bf16.mxu1 %v555_v5  ;;  %v625_v11 = vld [vmem:[%s740_s0 + $0x4] sm:$0xf]  ;;  %v633_v13 = vld [vmem:[%s740_s0 + $0x8] sm:$0x1]  ;;  %v33_v14 = vshrl.u32 %v620_v10, 16  ;;  %v36_v15 = vshll.u32 %v620_v10, 16  ;;  %vm668_vm6 = vmor %vm29_vm1, %vm30_vm2 }
   0x5   :  { %v560_v12 = vld [vmem:[%s739_s1 + $0x24] sm:$0xff]   ;;  %v42_v16 = vshll.u32 %v625_v11, 16  ;;  %v46_v17 = vshrl.u32 %v625_v11, 16  ;;  %v52_v19 = vshll.u32 %v633_v13, 16  ;;  %v457_v20 = vcombine.low %v620_v10, %v625_v11  ;;  %v648_v21 = vld [vmem:[%s740_s0 + $0xc] sm:$0xf]  ;;  %vm678_vm7 = vmor %vm280_vm4, %vm281_vm5 }
   0x6   :  { %v561_v18 = vld [vmem:[%s739_s1] sm:$0xff]   ;;  %v653_v22 = vld [vmem:[%s740_s0 + $0x10] sm:$0xf]  ;;  %v35_v23 = vrot.slane %v33_v14, 4  ;;  %v38_v24 = vrot.slane %v36_v15, 5  ;;  %v57_v29 = vshrl.u32 %v648_v21, 16 }
   0x7   :  { %510 = vmatpush3.bf16.msra.mxu0 %v554_v3  ;;  %524 = vmatpush3.bf16.msra.mxu1 %v555_v5  ;;  %v44_v25 = vrot.slane %v42_v16, 5  ;;  %v48_v26 = vrot.slane %v46_v17, 4  ;;  %v658_v27 = vld [vmem:[%s740_s0 + $0x14] sm:$0x1]  ;;  %v54_v28 = vrot.slane %v52_v19, 5  ;;  %v60_v30 = vshll.u32 %v648_v21, 16 }
   0x8   :  { %511 = vmatprep.subr.bf16.mxu0 %v556_v6  ;;  %525 = vmatprep.subr.bf16.mxu1 %v557_v7  ;;  %v66_v31 = vshll.u32 %v653_v22, 16  ;;  %v39_v32 = vor.u32 %v38_v24, %v35_v23  ;;  %v70_v34 = vshrl.u32 %v653_v22, 16  ;;  %v76_v35 = vshll.u32 %v658_v27, 16  ;;  %v564_v43 = vld [vmem:[%s739_s1 + $0x68] ss:$0 sps:$4 sm:$0xff]   ;;  %v565_v63 = vld [vmem:[%s739_s1 + $0x60] sm:$0xff]  }
   0x9   :  { %531 = vmatprep.mubr.msk.bf16.mxu1 %vm123_vm3, %v457_v20  ;;  %v49_v33 = vor.u32 %v48_v26, %v44_v25  ;;  %v59_v37 = vrot.slane %v57_v29, 4  ;;  %v62_v38 = vrot.slane %v60_v30, 5  ;;  %v288_v44 = vrot.slane %v633_v13, 5  ;;  %v566_v2 = vld [vmem:[%s739_s1 + $0x58] sm:$0xff]   ;;  %v567_v4 = vld [vmem:[%s739_s1 + $0x50] sm:$0xff]  }
   0xa   :  { %v68_v39 = vrot.slane %v66_v31, 5  ;;  %v40_v40 = vrot.slane %v39_v32, 4  ;;  %v72_v42 = vrot.slane %v70_v34, 4  ;;  %v78_v46 = vrot.slane %v76_v35, 5 }
   0xb   :  { %512 = vmatpush3.bf16.msra.mxu0 %v556_v6  ;;  %526 = vmatpush3.bf16.msra.mxu1 %v557_v7  ;;  %v50_v41 = vrot.slane %v49_v33, 4  ;;  %v63_v45 = vor.u32 %v62_v38, %v59_v37  ;;  %v458_v51 = vcombine.low %v648_v21, %v653_v22  ;;  %v466_v54 = vrot.slane %v620_v10, 9 }
   0xc   :  { %513 = vmatprep.subr.bf16.mxu0 %v558_v8  ;;  %527 = vmatprep.subr.bf16.mxu1 %v559_v9  ;;  %v45_v48 = vsel %vm668_vm6, %v40_v40, %v44_v25  ;;  %v73_v50 = vor.u32 %v72_v42, %v68_v39  ;;  %v285_v55 = vrot.slane %v625_v11, 5  ;;  %v347_v62 = vsel %vm130_vm0, %v564_v43, 0 }
   0xd   :  { %v55_v49 = vsel %vm668_vm6, %v50_v41, %v54_v28  ;;  %v64_v53 = vrot.slane %v63_v45, 4  ;;  %v292_v3 = vrot.slane %v653_v22, 5  ;;  %v295_v5 = vrot.slane %v658_v27, 5 }
   0xe   :  { %v448_v52 = vcombine.low %v45_v48, %v55_v49  ;;  %v74_v56 = vrot.slane %v73_v50, 4  ;;  %v286_v58 = vsel %vm678_vm7, %v466_v54, %v285_v55  ;;  %v287_v59 = vrot.slane %v285_v55, 4 }
   0xf   :  { %514 = vmatpush3.bf16.msra.mxu0 %v558_v8  ;;  %528 = vmatpush3.bf16.msra.mxu1 %v559_v9  ;;  %v69_v57 = vsel %vm668_vm6, %v64_v53, %v68_v39  ;;  %v467_v6 = vrot.slane %v648_v21, 9  ;;  %v294_v7 = vrot.slane %v292_v3, 4  ;;  %v568_v8 = vld [vmem:[%s739_s1 + $0x48] sm:$0xff]  }
  0x10   :  { %515 = vmatprep.subr.bf16.mxu0 %v560_v12  ;;  %529 = vmatprep.subr.bf16.mxu1 %v561_v18  ;;  %v79_v60 = vsel %vm668_vm6, %v74_v56, %v78_v46  ;;  %v289_v0 = vsel %vm678_vm7, %v287_v59, %v288_v44 }
  0x11   :  { %517 = vmatprep.mubr.msk.bf16.mxu0 %vm123_vm3, %v448_v52  ;;  %v449_v61 = vcombine.low %v69_v57, %v79_v60  ;;  %v477_v1 = vcombine.low %v286_v58, %v289_v0  ;;  %v293_v9 = vsel %vm678_vm7, %v467_v6, %v292_v3  ;;  %v296_v10 = vsel %vm678_vm7, %v294_v7, %v295_v5 }
  0x12   :  { %v478_v11 = vcombine.low %v293_v9, %v296_v10 }
  0x13   :  { %516 = vmatpush3.bf16.msra.mxu0 %v560_v12  ;;  %530 = vmatpush3.bf16.msra.mxu1 %v561_v18 }
  0x14   :  { %551 = vmatprep.subr.msk.bf16.mxu0 %vm130_vm0, %v564_v43 }
  0x16   :  { %532 = vmatmul.mubr.msk.bf16.vlgmr.msra.gmra.mxu1 %vm123_vm3, %v458_v51  ;;  %518 = vmatmul.mubr.msk.bf16.vlgmr.msra.gmra.mxu0 %vm123_vm3, %v449_v61 }
  0x17   :  { %536 = vmatpush3.bf16.msra.mxu0 %v347_v62  ;;  %545 = vmatprep.mubr.msk.bf16.mxu0 %vm123_vm3, %v477_v1 }
  0x18   :  { %537 = vmatprep.subr.bf16.mxu0 %v565_v63 }
  0x1b   :  { %538 = vmatpush3.bf16.msra.mxu0 %v565_v63 }
  0x1c   :  { %539 = vmatprep.subr.bf16.mxu0 %v566_v2 }
  0x1f   :  { %540 = vmatpush3.bf16.msra.mxu0 %v566_v2 }
  0x20   :  { %541 = vmatprep.subr.bf16.mxu0 %v567_v4 }
  0x23   :  { %542 = vmatpush3.bf16.msra.mxu0 %v567_v4 }
  0x24   :  { %543 = vmatprep.subr.bf16.mxu0 %v568_v8 }
  0x27   :  { %544 = vmatpush3.bf16.msra.mxu0 %v568_v8 }
  0x2a   :  { %546 = vmatmul.mubr.msk.bf16.vlgmr.msra.gmra.mxu0 %vm123_vm3, %v478_v11 }
  0xd6   :  { %v519_v12 = vpop.f32.mrf.mxu0  ;;  %v533_v13 = vpop.f32.mrf.mxu1 }
  0xd7   :  { %v272_v19 = vadd.f32 %v533_v13, %v519_v12 }
  0xd8   :  { %v168_v14 = vpop.f32.mrf.mxu0  ;;  %v263_v15 = vpop.f32.mrf.mxu1 }
  0xd9   :  { %v264_v21 = vadd.f32 %v263_v15, %v168_v14 }
  0xda   :  { %v520_v16 = vpop.f32.mrf.mxu0  ;;  %v534_v17 = vpop.f32.mrf.mxu1 }
  0xdb   :  { %v275_v25 = vadd.f32 %v534_v17, %v520_v16 }
  0xdc   :  { %v171_v18 = vpop.f32.mrf.mxu0  ;;  %v266_v23 = vpop.f32.mrf.mxu1 }
  0xdd   :  { %v267_v28 = vadd.f32 %v266_v23, %v171_v18 }
  0xea   :  { %v547_v20 = vpop.f32.mrf.mxu0 }
  0xeb   :  { %v400_v22 = vadd.f32 %v547_v20, %v272_v19 }
  0xec   :  { %v383_v24 = vpop.f32.mrf.mxu0 }
  0xed   :  { %404 = vst [vmem:[%s741_s2 + $0x10] sm:$0xff] %v400_v22  ;;  %v398_v26 = vadd.f32 %v383_v24, %v264_v21  ;;  %v417_v35 = vmul.f32 %v400_v22, %v400_v22 }
  0xee   :  { %v548_v27 = vpop.f32.mrf.mxu0 }
  0xef   :  { %402 = vst [vmem:[%s741_s2] sm:$0xff] %v398_v26  ;;  %v401_v29 = vadd.f32 %v548_v27, %v275_v25  ;;  %v415_v32 = vmul.f32 %v398_v26, %v398_v26 }
  0xf0   :  { %v386_v30 = vpop.f32.mrf.mxu0 }
  0xf1   :  { %405 = vst [vmem:[%s741_s2 + $0x18] sm:$0xff] %v401_v29  ;;  %v399_v31 = vadd.f32 %v386_v30, %v267_v28  ;;  %v418_v38 = vmul.f32 %v401_v29, %v401_v29 }
  0xf3   :  { %403 = vst [vmem:[%s741_s2 + $0x8] sm:$0xff] %v399_v31  ;;  %v406_v33 = vadd.f32 %v399_v31, %v398_v26  ;;  %v416_v34 = vmul.f32 %v399_v31, %v399_v31 }
  0xf5   :  { %v407_v36 = vadd.f32 %v406_v33, %v400_v22  ;;  %v419_v37 = vadd.f32 %v416_v34, %v415_v32 }
  0xf7   :  { %v408_v39 = vadd.f32 %v407_v36, %v401_v29  ;;  %v420_v40 = vadd.f32 %v419_v37, %v417_v35 }
  0xf9   :  { %v409_v41 = vrot.slane %v408_v39, 4  ;;  %v421_v42 = vadd.f32 %v420_v40, %v418_v38 }
  0xfb   :  { %v410_v43 = vadd.f32 %v409_v41, %v408_v39  ;;  %v422_v44 = vrot.slane %v421_v42, 4 }
  0xfd   :  { %v411_v45 = vrot.slane %v410_v43, 2  ;;  %v423_v46 = vadd.f32 %v422_v44, %v421_v42 }
  0xff   :  { %v412_v47 = vadd.f32 %v411_v45, %v410_v43  ;;  %v424_v48 = vrot.slane %v423_v46, 2 }
 0x101   :  { %v413_v49 = vrot.slane %v412_v47, 1  ;;  %v425_v50 = vadd.f32 %v424_v48, %v423_v46 }
 0x103   :  { %v426_v51 = vrot.slane %v425_v50, 1  ;;  %v414_v52 = vadd.f32 %v413_v49, %v412_v47 }
 0x105   :  { %v427_v53 = vadd.f32 %v426_v51, %v425_v50 }
 0x107   :  { %v429_v54 = vsel %vm428_vm8, %v414_v52, %v427_v53 }
 0x108   :  { %430 = vst [vmem:[%s742_s3] sm:$0x3] %v429_v54 }

// kernel: squeeze.2
= control target key start
LH: loop header
LB: loop body
LE: loop exit
PB: predicated region body
PF: predicated region fallthrough
CT: control target
= control target key end

     0   :  { %s131_s8 = smov 104   ;;  %s132_s9 = smov 112   ;;  %vm8_vm0 = vcmask 64512   ;;  %s222_s0 = inlined_call_operand.vmem [shape: f32[128], index: 0, kind: input, shape index: {}]   ;;  %s223_s1 = inlined_call_operand.vmem [shape: f32[16,8], index: 1, kind: output, shape index: {}]  }
   0x1   :  { %v5_v0 = vld [vmem:[%s222_s0] sm:$0x1]  ;;  %s130_s0 = smov 120   ;;  %s133_s10 = smov 96  }
   0x2   :  { %6 = vst [vmem:[#allocation0] sm:$0x1] %v5_v0  ;;  %s134_s11 = smov 88   ;;  %s135_s12 = smov 80  }
   0x3   :  { %s136_s13 = smov 72   ;;  %s137_s14 = smov 64  }
   0x4   :  { %s138_s17 = smov 56   ;;  %s139_s18 = smov 48  }
   0x5   :  { %s140_s19 = smov 40   ;;  %s141_s20 = smov 32  }
   0x6   :  { %s142_s21 = smov 24   ;;  %s143_s22 = smov 16  }
   0x7   :  { %s144_s23 = smov 8  }
   0x9   :  { %v10_v1 = vld [vmem:[#allocation0] sm:$0x1]  }
   0xa   :  { %v22_v2 = vld [vmem:[#allocation0] sm:$0x1]   ;;  %11 = vrot.lane.b32.xlu0 %v10_v1, %s130_s0 }
   0xb   :  { %23 = vrot.lane.b32.xlu1 %v22_v2, %s131_s8  ;;  %v16_v3 = vld [vmem:[#allocation0] sm:$0x1]  }
   0xc   :  { %v28_v4 = vld [vmem:[#allocation0] sm:$0x1]  }
   0xd   :  { %v34_v5 = vld [vmem:[#allocation0] sm:$0x1]  }
   0xe   :  { %17 = vrot.lane.b32.xlu0 %v16_v3, %s132_s9  ;;  %v40_v6 = vld [vmem:[#allocation0] sm:$0x1]  }
   0xf   :  { %29 = vrot.lane.b32.xlu1 %v28_v4, %s133_s10  ;;  %v46_v7 = vld [vmem:[#allocation0] sm:$0x1]  }
  0x10   :  { %v52_v8 = vld [vmem:[#allocation0] sm:$0x1]  }
  0x11   :  { %v58_v9 = vld [vmem:[#allocation0] sm:$0x1]  }
  0x12   :  { %35 = vrot.lane.b32.xlu0 %v34_v5, %s134_s11  ;;  %v64_v10 = vld [vmem:[#allocation0] sm:$0x1]  }
  0x13   :  { %41 = vrot.lane.b32.xlu1 %v40_v6, %s135_s12  ;;  %v7_v11 = vld [vmem:[#allocation0] sm:$0x1]  }
  0x14   :  { %9 = vst.msk [vmem:[%s223_s1] sm:$0x1] %vm8_vm0, %v7_v11   ;;  %v70_v12 = vld [vmem:[#allocation0] sm:$0x1]  }
  0x15   :  { %v76_v13 = vld [vmem:[#allocation0] sm:$0x1]  }
  0x16   :  { %47 = vrot.lane.b32.xlu0 %v46_v7, %s136_s13  ;;  %v82_v14 = vld [vmem:[#allocation0] sm:$0x1]  }
  0x17   :  { %53 = vrot.lane.b32.xlu1 %v52_v8, %s137_s14  ;;  %v88_v15 = vld [vmem:[#allocation0] sm:$0x1]  }
  0x18   :  { %v94_v16 = vld [vmem:[#allocation0] sm:$0x1]  }
  0x1a   :  { %59 = vrot.lane.b32.xlu0 %v58_v9, %s138_s17 }
  0x1b   :  { %65 = vrot.lane.b32.xlu1 %v64_v10, %s139_s18 }
  0x1e   :  { %71 = vrot.lane.b32.xlu0 %v70_v12, %s140_s19 }
  0x1f   :  { %77 = vrot.lane.b32.xlu1 %v76_v13, %s141_s20 }
  0x22   :  { %83 = vrot.lane.b32.xlu0 %v82_v14, %s142_s21 }
  0x23   :  { %89 = vrot.lane.b32.xlu1 %v88_v15, %s143_s22 }
  0x26   :  { %95 = vrot.lane.b32.xlu0 %v94_v16, %s144_s23 }
  0x7c   :  { %v12_v17 = vpop.permute.xlu0 %11  }
  0x7d   :  { %v24_v18 = vpop.permute.xlu1 %23   ;;  %100 = vst.msk [vmem:[%s223_s1 + $0x1] sm:$0x1] %vm8_vm0, %v12_v17  }
  0x7e   :  { %102 = vst.msk [vmem:[%s223_s1 + $0x3] sm:$0x1] %vm8_vm0, %v24_v18  }
  0x80   :  { %v18_v19 = vpop.permute.xlu0 %17  }
  0x81   :  { %v30_v20 = vpop.permute.xlu1 %29   ;;  %101 = vst.msk [vmem:[%s223_s1 + $0x2] sm:$0x1] %vm8_vm0, %v18_v19  }
  0x82   :  { %103 = vst.msk [vmem:[%s223_s1 + $0x4] sm:$0x1] %vm8_vm0, %v30_v20  }
  0x84   :  { %v36_v21 = vpop.permute.xlu0 %35  }
  0x85   :  { %v42_v22 = vpop.permute.xlu1 %41   ;;  %104 = vst.msk [vmem:[%s223_s1 + $0x5] sm:$0x1] %vm8_vm0, %v36_v21  }
  0x86   :  { %105 = vst.msk [vmem:[%s223_s1 + $0x6] sm:$0x1] %vm8_vm0, %v42_v22  }
  0x88   :  { %v48_v23 = vpop.permute.xlu0 %47  }
  0x89   :  { %v54_v24 = vpop.permute.xlu1 %53   ;;  %106 = vst.msk [vmem:[%s223_s1 + $0x7] sm:$0x1] %vm8_vm0, %v48_v23  }
  0x8a   :  { %107 = vst.msk [vmem:[%s223_s1 + $0x8] sm:$0x1] %vm8_vm0, %v54_v24  }
  0x8c   :  { %v60_v25 = vpop.permute.xlu0 %59  }
  0x8d   :  { %v66_v26 = vpop.permute.xlu1 %65   ;;  %108 = vst.msk [vmem:[%s223_s1 + $0x9] sm:$0x1] %vm8_vm0, %v60_v25  }
  0x8e   :  { %109 = vst.msk [vmem:[%s223_s1 + $0xa] sm:$0x1] %vm8_vm0, %v66_v26  }
  0x90   :  { %v72_v27 = vpop.permute.xlu0 %71  }
  0x91   :  { %v78_v28 = vpop.permute.xlu1 %77   ;;  %110 = vst.msk [vmem:[%s223_s1 + $0xb] sm:$0x1] %vm8_vm0, %v72_v27  }
  0x92   :  { %111 = vst.msk [vmem:[%s223_s1 + $0xc] sm:$0x1] %vm8_vm0, %v78_v28  }
  0x94   :  { %v84_v29 = vpop.permute.xlu0 %83  }
  0x95   :  { %v90_v30 = vpop.permute.xlu1 %89   ;;  %112 = vst.msk [vmem:[%s223_s1 + $0xd] sm:$0x1] %vm8_vm0, %v84_v29  }
  0x96   :  { %113 = vst.msk [vmem:[%s223_s1 + $0xe] sm:$0x1] %vm8_vm0, %v90_v30  }
  0x98   :  { %v96_v31 = vpop.permute.xlu0 %95  }
  0x99   :  { %114 = vst.msk [vmem:[%s223_s1 + $0xf] sm:$0x1] %vm8_vm0, %v96_v31  }

// kernel: tile.19
= control target key start
LH: loop header
LB: loop body
LE: loop exit
PB: predicated region body
PF: predicated region fallthrough
CT: control target
= control target key end

     0   :  { %s133_s10 = smov 120   ;;  %s134_s11 = smov 104   ;;  %vm3_vm0 = vcmask 64512   ;;  %vm9_vm1 = vcmask 1048512   ;;  %vm15_vm2 = vcmask 982912   ;;  %vm21_vm3 = vcmask 917312   ;;  %s209_s0 = inlined_call_operand.vmem [shape: f32[16,8], index: 0, kind: input, shape index: {}]   ;;  %s210_s1 = inlined_call_operand.vmem [shape: f32[1,128], index: 1, kind: output, shape index: {}]  }
   0x1   :  { %v103_v0 = vld [vmem:[%s209_s0 + $0xf] sm:$0x1]   ;;  %v105_v1 = vld [vmem:[%s209_s0 + $0xd] sm:$0x1]   ;;  %v104_v2 = vld [vmem:[%s209_s0 + $0xe] sm:$0x1]  }
   0x2   :  { %7 = vrot.lane.b32.xlu0 %v103_v0, %s133_s10  ;;  %19 = vrot.lane.b32.xlu1 %v105_v1, %s134_s11  ;;  %v106_v3 = vld [vmem:[%s209_s0 + $0xc] sm:$0x1]   ;;  %s135_s16 = smov 112   ;;  %s136_s17 = smov 96   ;;  %v107_v4 = vld [vmem:[%s209_s0 + $0xb] sm:$0x1]  }
   0x3   :  { %v108_v5 = vld [vmem:[%s209_s0 + $0xa] sm:$0x1]   ;;  %v2_v6 = vld [vmem:[%s209_s0] sm:$0x1]   ;;  %s137_s24 = smov 88   ;;  %s138_s25 = smov 80  }
   0x4   :  { %4 = vst.msk [vmem:[#allocation0] sm:$0x1] %vm3_vm0, %v2_v6   ;;  %v109_v7 = vld [vmem:[%s209_s0 + $0x9] sm:$0x1]   ;;  %v110_v8 = vld [vmem:[%s209_s0 + $0x8] sm:$0x1]  }
   0x5   :  { %s139_s30 = smov 72   ;;  %s140_s2 = smov 64   ;;  %v111_v9 = vld [vmem:[%s209_s0 + $0x7] sm:$0x1]   ;;  %v112_v10 = vld [vmem:[%s209_s0 + $0x6] sm:$0x1]  }
   0x6   :  { %13 = vrot.lane.b32.xlu0 %v104_v2, %s135_s16  ;;  %25 = vrot.lane.b32.xlu1 %v106_v3, %s136_s17  ;;  %s141_s7 = smov 56   ;;  %s142_s8 = smov 48   ;;  %v113_v11 = vld [vmem:[%s209_s0 + $0x5] sm:$0x1]   ;;  %v114_v12 = vld [vmem:[%s209_s0 + $0x4] sm:$0x1]  }
   0x7   :  { %s143_s13 = smov 40   ;;  %s144_s14 = smov 32   ;;  %v115_v13 = vld [vmem:[%s209_s0 + $0x3] sm:$0x1]   ;;  %v116_v14 = vld [vmem:[%s209_s0 + $0x2] sm:$0x1]  }
   0x8   :  { %s145_s19 = smov 24   ;;  %s146_s20 = smov 16   ;;  %v117_v15 = vld [vmem:[%s209_s0 + $0x1] sm:$0x1]   ;;  %vm27_vm4 = vcmask 851712   ;;  %vm33_vm5 = vcmask 786112  }
   0x9   :  { %s147_s0 = smov 8   ;;  %vm39_vm6 = vcmask 720512   ;;  %vm45_vm7 = vcmask 654912   ;;  %vm51_vm8 = vcmask 589312   ;;  %vm57_vm9 = vcmask 523712  }
   0xa   :  { %31 = vrot.lane.b32.xlu0 %v107_v4, %s137_s24  ;;  %37 = vrot.lane.b32.xlu1 %v108_v5, %s138_s25  ;;  %vm63_vm10 = vcmask 458112   ;;  %vm69_vm11 = vcmask 392512   ;;  %vm75_vm12 = vcmask 326912   ;;  %vm81_vm13 = vcmask 261312  }
   0xb   :  { %vm87_vm14 = vcmask 195712   ;;  %vm93_vm15 = vcmask 130112  }
   0xe   :  { %43 = vrot.lane.b32.xlu0 %v109_v7, %s139_s30  ;;  %49 = vrot.lane.b32.xlu1 %v110_v8, %s140_s2 }
  0x12   :  { %55 = vrot.lane.b32.xlu0 %v111_v9, %s141_s7  ;;  %61 = vrot.lane.b32.xlu1 %v112_v10, %s142_s8 }
  0x16   :  { %67 = vrot.lane.b32.xlu0 %v113_v11, %s143_s13  ;;  %73 = vrot.lane.b32.xlu1 %v114_v12, %s144_s14 }
  0x1a   :  { %79 = vrot.lane.b32.xlu0 %v115_v13, %s145_s19  ;;  %85 = vrot.lane.b32.xlu1 %v116_v14, %s146_s20 }
  0x1e   :  { %91 = vrot.lane.b32.xlu0 %v117_v15, %s147_s0 }
  0x74   :  { %v8_v16 = vpop.permute.xlu0 %7   ;;  %v20_v17 = vpop.permute.xlu1 %19  }
  0x75   :  { %10 = vst.msk [vmem:[#allocation0] sm:$0x1] %vm9_vm1, %v8_v16  }
  0x78   :  { %v14_v18 = vpop.permute.xlu0 %13   ;;  %v26_v19 = vpop.permute.xlu1 %25  }
  0x79   :  { %16 = vst.msk [vmem:[#allocation0] sm:$0x1] %vm15_vm2, %v14_v18  }
  0x7a   :  { %22 = vst.msk [vmem:[#allocation0] sm:$0x1] %vm21_vm3, %v20_v17  }
  0x7b   :  { %28 = vst.msk [vmem:[#allocation0] sm:$0x1] %vm27_vm4, %v26_v19  }
  0x7c   :  { %v32_v20 = vpop.permute.xlu0 %31   ;;  %v38_v21 = vpop.permute.xlu1 %37  }
  0x7d   :  { %34 = vst.msk [vmem:[#allocation0] sm:$0x1] %vm33_vm5, %v32_v20  }
  0x7e   :  { %40 = vst.msk [vmem:[#allocation0] sm:$0x1] %vm39_vm6, %v38_v21  }
  0x80   :  { %v44_v22 = vpop.permute.xlu0 %43   ;;  %v50_v23 = vpop.permute.xlu1 %49  }
  0x81   :  { %46 = vst.msk [vmem:[#allocation0] sm:$0x1] %vm45_vm7, %v44_v22  }
  0x82   :  { %52 = vst.msk [vmem:[#allocation0] sm:$0x1] %vm51_vm8, %v50_v23  }
  0x84   :  { %v56_v24 = vpop.permute.xlu0 %55   ;;  %v62_v25 = vpop.permute.xlu1 %61  }
  0x85   :  { %58 = vst.msk [vmem:[#allocation0] sm:$0x1] %vm57_vm9, %v56_v24  }
  0x86   :  { %64 = vst.msk [vmem:[#allocation0] sm:$0x1] %vm63_vm10, %v62_v25  }
  0x88   :  { %v68_v26 = vpop.permute.xlu0 %67   ;;  %v74_v27 = vpop.permute.xlu1 %73  }
  0x89   :  { %70 = vst.msk [vmem:[#allocation0] sm:$0x1] %vm69_vm11, %v68_v26  }
  0x8a   :  { %76 = vst.msk [vmem:[#allocation0] sm:$0x1] %vm75_vm12, %v74_v27  }
  0x8c   :  { %v80_v28 = vpop.permute.xlu0 %79   ;;  %v86_v29 = vpop.permute.xlu1 %85  }
  0x8d   :  { %82 = vst.msk [vmem:[#allocation0] sm:$0x1] %vm81_vm13, %v80_v28  }
  0x8e   :  { %88 = vst.msk [vmem:[#allocation0] sm:$0x1] %vm87_vm14, %v86_v29  }
  0x90   :  { %v92_v30 = vpop.permute.xlu0 %91  }
  0x91   :  { %94 = vst.msk [vmem:[#allocation0] sm:$0x1] %vm93_vm15, %v92_v30  }
  0x98   :  { %v99_v31 = vld [vmem:[#allocation0] sm:$0x1] }
  0x99   :  { %102 = vst [vmem:[%s210_s1] sm:$0x1] %v99_v31 }

// kernel: tile.18
= control target key start
LH: loop header
LB: loop body
LE: loop exit
PB: predicated region body
PF: predicated region fallthrough
CT: control target
= control target key end

     0   :  { %s28_s0 = inlined_call_operand.vmem [shape: f32[8], index: 0, kind: input, shape index: {}]   ;;  %s29_s1 = inlined_call_operand.vmem [shape: f32[16,8], index: 1, kind: output, shape index: {}]  }
   0x1   :  { %v4_v0 = vld [vmem:[%s28_s0] ss:$0 sm:$0xff] }
   0x2   :  { %5 = vst [vmem:[%s29_s1] sm:$0xff] %v4_v0  ;;  %8 = vst [vmem:[%s29_s1 + $0x8] sm:$0xff] %v4_v0 }

// kernel: conv_block.3
= control target key start
LH: loop header
LB: loop body
LE: loop exit
PB: predicated region body
PF: predicated region fallthrough
CT: control target
= control target key end

     0   :  { %s108_s0 = inlined_call_operand.vmem [shape: f32[2,16,128], index: 0, kind: input, shape index: {}]   ;;  %s109_s1 = inlined_call_operand.vmem [shape: f32[1,128], index: 1, kind: input, shape index: {}]   ;;  %s110_s2 = inlined_call_operand.vmem [shape: f32[1,128], index: 2, kind: input, shape index: {}]   ;;  %s111_s3 = inlined_call_operand.vmem [shape: f32[2,16,128], index: 3, kind: output, shape index: {}]  }
   0x1   :  { %v14_v0 = vld [vmem:[%s108_s0] sm:$0xff]  ;;  %v15_v4 = vld [vmem:[%s108_s0 + $0x8] sm:$0xff]  ;;  %v16_v5 = vld [vmem:[%s108_s0 + $0x10] sm:$0xff] }
   0x2   :  { %v56_v1 = vld [vmem:[%s109_s1] ss:$0 sm:$0xff]  ;;  %v17_v6 = vld [vmem:[%s108_s0 + $0x18] sm:$0xff] }
   0x3   :  { %v57_v2 = vld [vmem:[%s110_s2] ss:$0 sm:$0xff]  ;;  %v25_v3 = vmul.f32 %v56_v1, %v14_v0  ;;  %v26_v7 = vmul.f32 %v56_v1, %v15_v4  ;;  %v27_v8 = vmul.f32 %v56_v1, %v16_v5  ;;  %v28_v9 = vmul.f32 %v56_v1, %v17_v6 }
   0x5   :  { %v36_v10 = vadd.f32 %v57_v2, %v25_v3  ;;  %v37_v11 = vadd.f32 %v57_v2, %v26_v7  ;;  %v38_v12 = vadd.f32 %v57_v2, %v27_v8  ;;  %v39_v13 = vadd.f32 %v57_v2, %v28_v9 }
   0x7   :  { %v40_v14 = vmax.f32 %v36_v10, 0.0  ;;  %v41_v15 = vmax.f32 %v37_v11, 0.0  ;;  %v42_v16 = vmax.f32 %v38_v12, 0.0  ;;  %v43_v17 = vmax.f32 %v39_v13, 0.0 }
   0x9   :  { %v44_v18 = vmin.f32 %v40_v14, 6.0  ;;  %v45_v19 = vmin.f32 %v41_v15, 6.0  ;;  %v46_v20 = vmin.f32 %v42_v16, 6.0  ;;  %v47_v21 = vmin.f32 %v43_v17, 6.0 }
   0xb   :  { %48 = vst [vmem:[%s111_s3] sm:$0xff] %v44_v18  ;;  %49 = vst [vmem:[%s111_s3 + $0x8] sm:$0xff] %v45_v19 }
   0xc   :  { %50 = vst [vmem:[%s111_s3 + $0x10] sm:$0xff] %v46_v20  ;;  %51 = vst [vmem:[%s111_s3 + $0x18] sm:$0xff] %v47_v21 }

</bundles_post_ra>
